<compile_context>
chip_gen: v7x
topology: tpu7x:2x2x1
jax: 0.10.0
libtpu: 0.0.40
codegen_flags: <defaults>
</compile_context>

<pallas_src>
import functools

import jax
import jax.numpy as jnp
from jax.experimental import pallas as pl
from jax.experimental.pallas import tpu as pltpu

_LANE = 128
_VMEM_LIMIT_BYTES = 48 * 1024 * 1024   # safe on v7x (64 MiB physical VMEM)


def _cdiv(a, b):
    return (a + b - 1) // b


def _round_up(x, m):
    return _cdiv(x, m) * m


def _sublane_pack(dtype):
    # Rows that share one 32-bit sublane group: f32 -> 8, bf16 -> 16, int8 -> 32.
    return max(8, 32 // jnp.dtype(dtype).itemsize)


def _tile_budget_bytes():
    """Per-tile byte budget, sized per generation (conservative fallback)."""
    try:
        vmem = pltpu.get_tpu_info().vmem_capacity_bytes
    except Exception:  # pragma: no cover - unknown/older runtime
        vmem = 64 * 1024 * 1024
    # v7x (64 MiB VMEM): 4 MiB tiles; v5e/v6e (128 MiB VMEM): 8 MiB tiles.
    return 4 * 1024 * 1024 if vmem <= 64 * 1024 * 1024 else 8 * 1024 * 1024


def _mse_kernel(err_ref, out_ref, *, tk, total_t, tiles_per_par):
    """Grid (n_par, tiles_per_par): accumulate sum(x^2)/T into the resident
    output block; ragged / redundant tiles are masked in-kernel."""
    p = pl.program_id(0)          # parallel slice of the T reduction
    k = pl.program_id(1)          # tile index within the slice

    @pl.when(k == 0)
    def _():
        out_ref[...] = jnp.zeros_like(out_ref)

    # Logical tile index; may point past the real data (clamped in index_map),
    # in which case every column is masked out below.
    t = p * tiles_per_par + k
    col = t * tk + jax.lax.broadcasted_iota(jnp.int32, err_ref.shape, 1)

    x = err_ref[...].astype(jnp.float32)
    x = jnp.where(col < total_t, x, 0.0)          # in-kernel ragged-tail mask

    partial = jnp.sum(x * x, axis=1, keepdims=True) * (1.0 / total_t)  # (B, 1)
    out_ref[...] += partial                        # broadcast over 128 lanes


def square_error_loss(error: jax.Array, *, tk: int | None = None,
                      n_par: int | None = None) -> jax.Array:
    """Pallas equivalent of SquareErrorLoss.forward for 2-D (B, T) input."""
    assert error.ndim == 2, "expected (batch, samples) input"
    B, T = error.shape
    T128 = _round_up(T, _LANE)

    dtype_bytes = jnp.dtype(error.dtype).itemsize
    b_pad = _round_up(B, _sublane_pack(error.dtype))   # sublane-padded rows

    # --- tile width: largest lane-aligned tile within the byte budget ---
    if tk is None:
        budget = _tile_budget_bytes()
        tk = max(_LANE, (budget // (b_pad * dtype_bytes)) // _LANE * _LANE)
    else:
        tk = max(_LANE, _round_up(tk, _LANE))
    tk = min(tk, T128)

    n_tiles = _cdiv(T128, tk)
    if n_par is None:
        n_par = 2 if n_tiles >= 2 else 1      # engage both TCs on v7x
    tiles_per_par = _cdiv(n_tiles, n_par)
    # Near-even, lane-aligned tile width for the chosen split (never exceeds
    # the budgeted tk).
    tk = _round_up(_cdiv(T128, n_par * tiles_per_par), _LANE)

    # Valid block positions of the *real* (unpadded) array along T.
    n_data_blocks = _cdiv(T, tk)

    def in_index_map(p, k):
        t = p * tiles_per_par + k
        # Clamp so the DMA window always stays in (or at the edge of) the
        # array; redundant tiles are fully masked in-kernel.
        return (0, jnp.minimum(t, n_data_blocks - 1))

    kernel = functools.partial(
        _mse_kernel, tk=tk, total_t=T, tiles_per_par=tiles_per_par)

    out = pl.pallas_call(
        kernel,
        # Each parallel slice owns a lane-aligned (B, 128) partial block.
        out_shape=jax.ShapeDtypeStruct((B, n_par * _LANE), jnp.float32),
        grid_spec=pltpu.PrefetchScalarGridSpec(
            num_scalar_prefetch=0,
            grid=(n_par, tiles_per_par),
            in_specs=[pl.BlockSpec((B, tk), in_index_map)],
            out_specs=pl.BlockSpec((B, _LANE), lambda p, k: (0, p)),
        ),
        compiler_params=pltpu.CompilerParams(
            dimension_semantics=("parallel", "arbitrary"),
            vmem_limit_bytes=_VMEM_LIMIT_BYTES,
        ),
    )(error)

    # All 128 lanes of a partial block carry the same value; take lane 0 of
    # each slice and combine (tiny (B, n_par) wrapper-side reduction).
    partials = out.reshape(B, n_par, _LANE)[:, :, 0]
    return jnp.sum(partials, axis=1) if n_par > 1 else partials[:, 0]


if __name__ == "__main__":
    key = jax.random.PRNGKey(0)
    k0, k1 = jax.random.split(key)

    # Default path: T=1000 (not a multiple of 128) exercises the in-kernel mask.
    B, T = 4, 1000
    error = jax.random.normal(k0, (B, T), dtype=jnp.float32)
    ref = jnp.mean(error ** 2, axis=1)

    out = jax.block_until_ready(square_error_loss(error))
    assert out.shape == (B,)
    assert jnp.allclose(out, ref, atol=1e-5, rtol=1e-5)

    # Forced small tiles: multi-tile pipeline + 2-way parallel split.
    out_tiled = jax.block_until_ready(square_error_loss(error, tk=128))
    assert jnp.allclose(out_tiled, ref, atol=1e-5, rtol=1e-5)

    # Odd tile count + small batch: one clamped, fully-masked redundant tile
    # on the second parallel slice.
    B2, T2 = 3, 1100
    error2 = jax.random.normal(k1, (B2, T2), dtype=jnp.float32)
    ref2 = jnp.mean(error2 ** 2, axis=1)
    out2 = jax.block_until_ready(square_error_loss(error2, tk=384))
    assert out2.shape == (B2,)
    assert jnp.allclose(out2, ref2, atol=1e-5, rtol=1e-5)

    print("KERNEL_OK")
</pallas_src>

<mosaic_0001>
module attributes {stable_mosaic.version = 11 : i64} {
  func.func @_mse_kernel(%arg0: i32, %arg1: i32, %arg2: memref<4x1024xf32, #tpu.memory_space<vmem>>, %arg3: memref<4x128xf32, #tpu.memory_space<vmem>>) attributes {dimension_semantics = [#tpu.dimension_semantics<parallel>, #tpu.dimension_semantics<arbitrary>], iteration_bounds = array<i64: 1, 1>, scalar_prefetch = 0 : i64, scratch_operands = 0 : i64, tpu.core_type = #tpu.core_type<tc>, window_params = [{transform_indices = @transform_0, window_bounds = array<i64: 4, 1024>}, {transform_indices = @transform_1, window_bounds = array<i64: 4, 128>}]} {
    %c0_i32 = arith.constant 0 : i32
    %0 = arith.cmpi eq, %arg1, %c0_i32 : i32
    %1 = arith.extui %0 : i1 to i32
    %c0_i32_0 = arith.constant 0 : i32
    %2 = arith.cmpi ne, %1, %c0_i32_0 : i32
    scf.if %2 {
      %cst_8 = arith.constant 0.000000e+00 : f32
      %23 = vector.broadcast %cst_8 : f32 to vector<4x128xf32>
      %c0_9 = arith.constant 0 : index
      %c0_10 = arith.constant 0 : index
      %24 = vector.load %arg3[%c0_9, %c0_10] : memref<4x128xf32, #tpu.memory_space<vmem>>, vector<4x128xf32>
      tpu.vector_store %arg3[%c0_9, %c0_10], %23 {strides = array<i32>} : memref<4x128xf32, #tpu.memory_space<vmem>>, vector<4x128xf32>,
    } else {
    }
    %c1_i32 = arith.constant 1 : i32
    %3 = arith.muli %arg0, %c1_i32 : i32
    %4 = arith.addi %3, %arg1 : i32
    %c1024_i32 = arith.constant 1024 : i32
    %5 = arith.muli %4, %c1024_i32 : i32
    %6 = tpu.iota {dimensions = array<i32: 1>} : vector<4x1024xi32>
    %7 = vector.broadcast %5 : i32 to vector<4x1024xi32>
    %8 = arith.addi %7, %6 : vector<4x1024xi32>
    %c0 = arith.constant 0 : index
    %c0_1 = arith.constant 0 : index
    %9 = vector.load %arg2[%c0, %c0_1] : memref<4x1024xf32, #tpu.memory_space<vmem>>, vector<4x1024xf32>
    %c1000_i32 = arith.constant 1000 : i32
    %10 = vector.broadcast %c1000_i32 : i32 to vector<4x1024xi32>
    %11 = arith.cmpi slt, %8, %10 : vector<4x1024xi32>
    %cst = arith.constant 0.000000e+00 : f32
    %12 = vector.broadcast %cst : f32 to vector<4x1024xf32>
    %13 = arith.select %11, %9, %12 : vector<4x1024xi1>, vector<4x1024xf32>
    %14 = arith.mulf %13, %13 : vector<4x1024xf32>
    %cst_2 = arith.constant dense<0.000000e+00> : vector<4xf32>
    %15 = vector.multi_reduction <add>, %14, %cst_2 [1] : vector<4x1024xf32> to vector<4xf32>
    %16 = vector.shape_cast %15 : vector<4xf32> to vector<4x1xf32>
    %cst_3 = arith.constant 1.000000e-03 : f32
    %17 = vector.broadcast %cst_3 : f32 to vector<4x1xf32>
    %18 = arith.mulf %16, %17 : vector<4x1xf32>
    %c0_4 = arith.constant 0 : index
    %c0_5 = arith.constant 0 : index
    %19 = vector.load %arg3[%c0_4, %c0_5] : memref<4x128xf32, #tpu.memory_space<vmem>>, vector<4x128xf32>
    %20 = vector.broadcast %18 : vector<4x1xf32> to vector<4x128xf32>
    %21 = arith.addf %19, %20 : vector<4x128xf32>
    %c0_6 = arith.constant 0 : index
    %c0_7 = arith.constant 0 : index
    %22 = vector.load %arg3[%c0_6, %c0_7] : memref<4x128xf32, #tpu.memory_space<vmem>>, vector<4x128xf32>
    tpu.vector_store %arg3[%c0_6, %c0_7], %21 {strides = array<i32>} : memref<4x128xf32, #tpu.memory_space<vmem>>, vector<4x128xf32>,
    return
  }
  func.func @transform_0(%arg0: i32, %arg1: i32) -> (i32, i32) {
    %c1_i32 = arith.constant 1 : i32
    %0 = arith.muli %arg0, %c1_i32 : i32
    %1 = arith.addi %0, %arg1 : i32
    %c0_i32 = arith.constant 0 : i32
    %2 = arith.minsi %1, %c0_i32 : i32
    %c0_i32_0 = arith.constant 0 : i32
    %c0_i32_1 = arith.constant 0 : i32
    return %c0_i32_0, %2 : i32, i32
  }
  func.func @transform_1(%arg0: i32, %arg1: i32) -> (i32, i32) {
    %c0_i32 = arith.constant 0 : i32
    %c0_i32_0 = arith.constant 0 : i32
    return %c0_i32, %arg0 : i32, i32
  }
}

</mosaic_0001>

<bundles_post_ra>
// kernel: tpu_custom_call.1
= control target key start
LH: loop header
LB: loop body
LE: loop exit
PB: predicated region body
PF: predicated region fallthrough
CT: control target
= control target key end

     0   :  { %6 = vsyncpa [#allocation3], 0  ;;  %s235_s0 = inlined_call_operand.hbm [shape: f32[4,1000], index: 0, kind: input, shape index: {}]   ;;  %s236_s1 = inlined_call_operand.hbm [shape: f32[4,128], index: 1, kind: output, shape index: {}]  }
   0x1   :  { %7 = vsyncpa [#allocation4], 0  ;;  %s190_s6 = smov [#allocation2]   ;;  %s142_s10 = scalar_lea.hbm %s235_s0, 512 }
   0x2   :  { %s20_s7 = sshll.u32 %s190_s6, 4  ;;  %p143_p0 = scmp.ne.s32.totalorder %s235_s0, %s142_s10  ;;  %s21_s7 = int_to_ptr.vmem [resolvable:$true] %s20_s7 }
   0x3   :  { %p146_p1 = scmp.lt.u32.totalorder %s142_s10, %s235_s0 }
   0x5   :  { %p148_p2 = pnand %p146_p1, %p143_p0 }
   0x7   :  { %151 = shalt.err (!%p148_p2)
}
   0x8   :  { %s152_s15 = scalar_lea.vmem %s21_s7, 512  ;;  %p157_p4 = scmp.lt.s32.totalorder %s21_s7, %s21_s7 }
   0x9   :  { %p153_p3 = scmp.ne.s32.totalorder %s21_s7, %s152_s15  ;;  %p158_p5 = scmp.lt.s32.totalorder %s152_s15, %s152_s15 }
   0xb   :  { %p159_p6 = por %p158_p5, %p157_p4 }
   0xd   :  { %p160_p7 = pnand %p159_p6, %p153_p3 }
   0xf   :  { %163 = shalt.err (!%p160_p7)
}
  0x10   :  { %23 = dma.hbm_to_vmem [thread:$0]  %s235_s0, 512, %s21_s7, [#allocation3]  }
  0x11   :  { %186 = dma.done.wait [#allocation3], 512  }
  0x12   :  { %187 = vsyncadd [#allocation3], 4294966784  ;;  %v38_v0 = vlaneseq  ;;  %v191_v1 = vmov 0.0   ;;  %v56_v3 = vld [vmem:[#allocation2] sm:$0xff]  ;;  %v57_v4 = vld [vmem:[#allocation2 + $0x8] sm:$0xff]  ;;  %vm96_vm0 = vcmask 1043456  }
  0x13   :  { %35 = vst [vmem:[#allocation5] sm:$0xf] %v191_v1  ;;  %v58_v5 = vld [vmem:[#allocation2 + $0x10] sm:$0xff]  ;;  %v59_v7 = vld [vmem:[#allocation2 + $0x18] sm:$0xff]  ;;  %v72_v8 = vcombine.high %v56_v3, %v56_v3  ;;  %v73_v9 = vcombine.high %v57_v4, %v57_v4  ;;  %v88_v10 = vmul.f32 %v56_v3, %v56_v3  ;;  %v90_v11 = vmul.f32 %v57_v4, %v57_v4  ;;  %s192_s0 = smov [#allocation5]  }
  0x14   :  { %v39_v2 = vand.u32 127, %v38_v0  ;;  %v74_v12 = vcombine.high %v58_v5, %v58_v5  ;;  %v75_v16 = vcombine.high %v59_v7, %v59_v7  ;;  %v92_v17 = vmul.f32 %v58_v5, %v58_v5  ;;  %s124_s18 = sshll.u32 %s192_s0, 4  ;;  %s125_s18 = int_to_ptr.vmem [resolvable:$true] %s124_s18 }
  0x15   :  { %v89_v13 = vmul.f32 %v72_v8, %v72_v8  ;;  %v91_v14 = vmul.f32 %v73_v9, %v73_v9  ;;  %v97_v15 = vsel %vm96_vm0, %v88_v10, 0.0  ;;  %v100_v19 = vsel %vm96_vm0, %v90_v11, 0.0  ;;  %s164_s19 = scalar_lea.vmem %s125_s18, 64  ;;  %p169_p9 = scmp.lt.s32.totalorder %s125_s18, %s125_s18 }
  0x16   :  { %v46_v6 = vadd.s32 896, %v39_v2  ;;  %v93_v21 = vmul.f32 %v74_v12, %v74_v12  ;;  %v94_v25 = vmul.f32 %v59_v7, %v59_v7  ;;  %v104_v26 = vsel %vm96_vm0, %v92_v17, 0.0  ;;  %p165_p8 = scmp.ne.s32.totalorder %s125_s18, %s164_s19  ;;  %p170_p10 = scmp.lt.s32.totalorder %s164_s19, %s164_s19 }
  0x17   :  { %v98_v18 = vsel %vm96_vm0, %v89_v13, 0.0  ;;  %v102_v22 = vsel %vm96_vm0, %v91_v14, 0.0 }
  0x18   :  { %vm67_vm1 = vcmp.lt.s32.totalorder %v46_v6, 1000  ;;  %v99_v20 = vadd.f32 %v98_v18, %v97_v15  ;;  %v106_v29 = vsel %vm96_vm0, %v93_v21, 0.0  ;;  %v108_v31 = vsel %vm96_vm0, %v94_v25, 0.0  ;;  %p171_p11 = por %p170_p10, %p169_p9 }
  0x19   :  { %v87_v23 = vsel %vm67_vm1, %v75_v16, 0.0 }
  0x1a   :  { %v101_v24 = vadd.f32 %v100_v19, %v99_v20  ;;  %v95_v28 = vmul.f32 %v87_v23, %v87_v23  ;;  %v115_v37 = vld [vmem:[#allocation5] sm:$0xf]  ;;  %p172_p12 = pnand %p171_p11, %p165_p8 }
  0x1c   :  { %v103_v27 = vadd.f32 %v102_v22, %v101_v24  ;;  %v110_v33 = vsel %vm96_vm0, %v95_v28, 0.0 }
  0x1e   :  { %v105_v30 = vadd.f32 %v104_v26, %v103_v27 }
  0x20   :  { %v107_v32 = vadd.f32 %v106_v29, %v105_v30 }
  0x22   :  { %v109_v34 = vadd.f32 %v108_v31, %v107_v32 }
  0x24   :  { %v111_v35 = vadd.f32 %v110_v33, %v109_v34 }
  0x26   :  { %112 = vadd.xlane.f32.xlu0 %v111_v35 }
  0xb3   :  { %v113_v36 = vpop.xlane.xlu0 %112 }
  0xb4   :  { %v114_v38 = vmul.f32 0.001, %v113_v36 }
  0xb6   :  { %v116_v39 = vadd.f32 %v115_v37, %v114_v38 }
  0xb8   :  { %117 = vst [vmem:[#allocation5] sm:$0xf] %v116_v39 }
  0xb9   :  { %175 = shalt.err (!%p172_p12)
}
  0xba   :  { %s176_s22 = scalar_lea.hbm %s236_s1, 64 }
  0xbb   :  { %p177_p13 = scmp.ne.s32.totalorder %s236_s1, %s176_s22  ;;  %p180_p0 = scmp.lt.u32.totalorder %s176_s22, %s236_s1 }
  0xbd   :  { %p182_p1 = pnand %p180_p0, %p177_p13 }
  0xbf   :  { %185 = shalt.err (!%p182_p1)
}
  0xc0   :  { %127 = dma.vmem_to_hbm [thread:$0]  %s125_s18, 64, %s236_s1, [#allocation4]  }
  0xc1   :  { %188 = dma.done.wait [#allocation4], 64  }
  0xc2   :  { %189 = vsyncadd [#allocation4], 4294967232 }
  0xc3   :  { %131 = vsyncpa [#allocation3], 1 }
  0xc4   :  { %132 = vsyncpa [#allocation4], 1 }

</bundles_post_ra>
